<compile_context>
chip_gen: v6e
topology: v6e:2x2x1
jax: 0.10.0
libtpu: 0.0.40
codegen_flags: <defaults>
</compile_context>

<pallas_src>
import functools

import jax
import jax.numpy as jnp
from jax.experimental import pallas as pl
from jax.experimental.pallas import tpu as pltpu

N_MAP = 25   # 25 fixed 3x3 windows: k = i // 5, v = i % 5
GROUP = 4    # mappings packed per grid step (block-diagonal weights)


def _mish(x):
    # mish(x) = x * tanh(softplus(x)) = x * (s - 1) / (s + 1), s = (1 + e^x)^2
    # One exp + approx reciprocal instead of exp + log + tanh; for x > 20
    # mish(x) == x to f32 precision, which also avoids overflow of s.
    e = jnp.exp(jnp.minimum(x, 20.0))
    s = (1.0 + e) * (1.0 + e)
    t = (s - 1.0) * pl.reciprocal(s + 1.0, approx=True)
    return jnp.where(x > 20.0, x, x * t)


def _fused_kernel(num_res,
                  patch_ref, w1_ref, b1_ref, scale_ref, shift_ref,
                  wr_ref, br_ref, wf_ref, bf_ref,
                  nw1_ref, nb1_ref, nw2_ref, nb2_ref, nw3_ref, nb3_ref,
                  out_ref, acc_ref):
    """grid = (batch_tiles, n_groups); one step = 4 Mapping modules."""
    g = pl.program_id(1)

    @pl.when(g == 0)
    def _():
        acc_ref[...] = jnp.zeros_like(acc_ref)

    x = patch_ref[...].astype(jnp.bfloat16)        # (tb, GROUP*Cin*9)
    scale = scale_ref[g]                           # (1, GROUP*Cm)  f32
    shift = shift_ref[g]

    # conv_1: 3x3 conv on a 3x3 patch == matmul (block-diagonal over 4 maps)
    h = jnp.dot(x, w1_ref[g], preferred_element_type=jnp.float32) + b1_ref[g]
    h = _mish(h * scale + shift)                   # eval-mode BN + Mish

    # pointwise residual blocks (block-diagonal 1x1 convs keep maps separate)
    for r in range(num_res):
        idx = g * num_res + r
        hr = jnp.dot(h.astype(jnp.bfloat16), wr_ref[idx],
                     preferred_element_type=jnp.float32) + br_ref[idx]
        h = h + _mish(hr)

    # same BatchNorm module re-applied (as in the PyTorch forward), then Mish
    h = _mish(h * scale + shift)

    # final 1x1 conv; wf is row-stacked (4*Cm, Cout) so this matmul also sums
    # the 4 mappings of this group.  Accumulate the group sums over the grid.
    acc_ref[...] += jnp.dot(h.astype(jnp.bfloat16), wf_ref[g],
                            preferred_element_type=jnp.float32) + bf_ref[g]

    # fused NNUE head on the last mapping step (spatial is 1x1, so
    # stack/sum/flatten/sum reduces to the accumulated (B, Cout))
    @pl.when(g == pl.num_programs(1) - 1)
    def _():
        f = acc_ref[...].astype(jnp.bfloat16)
        h1 = jnp.dot(f, nw1_ref[...],
                     preferred_element_type=jnp.float32) + nb1_ref[...]
        h1 = jnp.clip(h1, 0.0, 1.0).astype(jnp.bfloat16)
        h2 = jnp.dot(h1, nw2_ref[...],
                     preferred_element_type=jnp.float32) + nb2_ref[...]
        h2 = jnp.clip(h2, 0.0, 1.0).astype(jnp.bfloat16)
        out_ref[...] = jnp.dot(h2, nw3_ref[...],
                               preferred_element_type=jnp.float32) + nb3_ref[...]


def conv3nnue_forward(x, params, *, tb=None):
    """x: NCHW float32, (B, Cin, H, W) with H, W >= 7. Returns (B, 1)."""
    B, Cin, _, _ = x.shape
    F = Cin * 9
    n_groups, GF, GC = params["w1"].shape
    group = GF // F
    Cout = params["wf"].shape[2]
    R = params["wr"].shape[0] // n_groups

    # 25 fixed 3x3 windows, flattened, packed `group` per row, zero-padded.
    patches = []
    for i in range(N_MAP):
        k, v = i // 5, i % 5
        patches.append(x[:, :, k:k + 3, v:v + 3].reshape(B, F))
    patches += [jnp.zeros((B, F), x.dtype)] * (n_groups * group - N_MAP)
    patches = jnp.stack(patches, 0)                               # (28, B, F)
    patches = (patches.reshape(n_groups, group, B, F)
               .transpose(0, 2, 1, 3)
               .reshape(n_groups, B, GF))                         # (7, B, GF)

    # batch tiling (kept modest so it also fits v7x's 64 MiB VMEM)
    if tb is None:
        tb = min(512, max(8, -(-B // 8) * 8))
    B_pad = -(-B // tb) * tb
    if B_pad != B:
        patches = jnp.pad(patches, ((0, 0), (0, B_pad - B), (0, 0)))
    n_bt = B_pad // tb

    def resident(a):  # VMEM-resident weight: full array, constant index_map
        n = a.ndim
        return pl.BlockSpec(a.shape, lambda b, g, _n=n: (0,) * _n)

    grid_spec = pltpu.PrefetchScalarGridSpec(
        num_scalar_prefetch=0,
        grid=(n_bt, n_groups),
        in_specs=[
            pl.BlockSpec((None, tb, GF), lambda b, g: (g, b, 0)),  # patches
            resident(params["w1"]), resident(params["b1"]),
            resident(params["scale"]), resident(params["shift"]),
            resident(params["wr"]), resident(params["br"]),
            resident(params["wf"]), resident(params["bf"]),
            resident(params["nw1"]), resident(params["nb1"]),
            resident(params["nw2"]), resident(params["nb2"]),
            resident(params["nw3"]), resident(params["nb3"]),
        ],
        out_specs=pl.BlockSpec((tb, 1), lambda b, g: (b, 0)),
        scratch_shapes=[pltpu.VMEM((tb, Cout), jnp.float32)],
    )
    out = pl.pallas_call(
        functools.partial(_fused_kernel, R),
        out_shape=jax.ShapeDtypeStruct((B_pad, 1), jnp.float32),
        grid_spec=grid_spec,
        compiler_params=pltpu.CompilerParams(
            dimension_semantics=("parallel", "arbitrary")),
    )(patches, params["w1"], params["b1"], params["scale"], params["shift"],
      params["wr"], params["br"], params["wf"], params["bf"],
      params["nw1"], params["nb1"], params["nw2"], params["nb2"],
      params["nw3"], params["nb3"])
    return out[:B]


def init_params(key, in_channel, middle_channel, out_channel, num_res,
                nnue_hidden, group=GROUP):
    n_pad = -(-N_MAP // group) * group            # 28
    n_groups = n_pad // group                     # 7
    F = in_channel * 9
    Cm, Cout = middle_channel, out_channel
    eps = 1e-5
    ks = jax.random.split(key, 16)

    # ---- per-mapping parameters (25 mappings) ----
    w1 = jax.random.normal(ks[0], (N_MAP, F, Cm), jnp.float32) * 0.1
    b1 = jax.random.normal(ks[1], (N_MAP, Cm), jnp.float32) * 0.1
    gamma = 1.0 + 0.1 * jax.random.normal(ks[2], (N_MAP, Cm), jnp.float32)
    beta = 0.1 * jax.random.normal(ks[3], (N_MAP, Cm), jnp.float32)
    r_mean = 0.1 * jax.random.normal(ks[4], (N_MAP, Cm), jnp.float32)
    r_var = 0.5 + jax.random.uniform(ks[5], (N_MAP, Cm), jnp.float32)
    scale = gamma / jnp.sqrt(r_var + eps)         # eval-mode BN affine
    shift = beta - r_mean * scale
    wr = jax.random.normal(ks[6], (N_MAP, num_res, Cm, Cm), jnp.float32) * 0.1
    br = jax.random.normal(ks[7], (N_MAP, num_res, Cm), jnp.float32) * 0.1
    wf = jax.random.normal(ks[8], (N_MAP, Cm, Cout), jnp.float32) * 0.1
    bf = jax.random.normal(ks[9], (N_MAP, Cout), jnp.float32) * 0.1

    # ---- pad 25 -> 28 with zero-contribution mappings ----
    def pad0(a):
        return jnp.concatenate(
            [a, jnp.zeros((n_pad - N_MAP,) + a.shape[1:], a.dtype)], 0)
    w1, b1, shift, wr, br, wf, bf = map(pad0, (w1, b1, shift, wr, br, wf, bf))
    scale = jnp.concatenate(
        [scale, jnp.ones((n_pad - N_MAP, Cm), jnp.float32)], 0)

    # ---- pack `group` mappings per grid step ----
    def bdiag(w):                                  # (G, a, b) -> (G*a, G*b)
        G, a, b = w.shape
        o = jnp.zeros((G * a, G * b), w.dtype)
        for g in range(G):
            o = o.at[g * a:(g + 1) * a, g * b:(g + 1) * b].set(w[g])
        return o

    w1g = jnp.stack([bdiag(w1[g * group:(g + 1) * group])
                     for g in range(n_groups)])                  # (7, GF, GC)
    wrg = jnp.stack([bdiag(wr[g * group:(g + 1) * group, r])
                     for g in range(n_groups)
                     for r in range(num_res)])                   # (7*R, GC, GC)
    wfg = jnp.stack([wf[g * group:(g + 1) * group].reshape(group * Cm, Cout)
                     for g in range(n_groups)])                  # (7, GC, Cout)

    b1g = b1.reshape(n_groups, 1, group * Cm)
    scaleg = scale.reshape(n_groups, 1, group * Cm)
    shiftg = shift.reshape(n_groups, 1, group * Cm)
    brg = (br.reshape(n_groups, group, num_res, Cm)
           .transpose(0, 2, 1, 3)
           .reshape(n_groups * num_res, 1, group * Cm))
    bfg = bf.reshape(n_groups, group, Cout).sum(1).reshape(n_groups, 1, Cout)

    # ---- NNUE head ----
    nw1 = jax.random.normal(ks[10], (Cout, nnue_hidden), jnp.float32) * 0.1
    nb1 = jax.random.normal(ks[11], (1, nnue_hidden), jnp.float32) * 0.1
    nw2 = jax.random.normal(ks[12], (nnue_hidden, nnue_hidden), jnp.float32) * 0.1
    nb2 = jax.random.normal(ks[13], (1, nnue_hidden), jnp.float32) * 0.1
    nw3 = jax.random.normal(ks[14], (nnue_hidden, 1), jnp.float32) * 0.1
    nb3 = jax.random.normal(ks[15], (1, 1), jnp.float32) * 0.1

    bf16 = lambda a: a.astype(jnp.bfloat16)        # MXU inputs in bf16
    return dict(w1=bf16(w1g), b1=b1g, scale=scaleg, shift=shiftg,
                wr=bf16(wrg), br=brg, wf=bf16(wfg), bf=bfg,
                nw1=bf16(nw1), nb1=nb1, nw2=bf16(nw2), nb2=nb2,
                nw3=bf16(nw3), nb3=nb3)


if __name__ == "__main__":
    B, Cin, Cm, Cout = 2, 4, 32, 32
    num_point_wise = 2
    H = W = 7          # forward slices k:k+3, v:v+3 with k, v in 0..4 -> needs >= 7
    nnue_hidden = 32

    key = jax.random.PRNGKey(0)
    k_x, k_p = jax.random.split(key)
    x = jax.random.normal(k_x, (B, Cin, H, W), jnp.float32)
    params = init_params(k_p, Cin, Cm, Cout, num_point_wise, nnue_hidden)

    out = conv3nnue_forward(x, params)
    jax.block_until_ready(out)
    assert out.shape == (B, 1), out.shape
    print("KERNEL_OK")
</pallas_src>

<mosaic_0001>
module attributes {stable_mosaic.version = 11 : i64} {
  func.func @_fused_kernel(%arg0: i32, %arg1: i32, %arg2: memref<1x8x144xf32, #tpu.memory_space<vmem>>, %arg3: memref<7x144x128xbf16, #tpu.memory_space<vmem>>, %arg4: memref<7x1x128xf32, #tpu.memory_space<vmem>>, %arg5: memref<7x1x128xf32, #tpu.memory_space<vmem>>, %arg6: memref<7x1x128xf32, #tpu.memory_space<vmem>>, %arg7: memref<14x128x128xbf16, #tpu.memory_space<vmem>>, %arg8: memref<14x1x128xf32, #tpu.memory_space<vmem>>, %arg9: memref<7x128x32xbf16, #tpu.memory_space<vmem>>, %arg10: memref<7x1x32xf32, #tpu.memory_space<vmem>>, %arg11: memref<32x32xbf16, #tpu.memory_space<vmem>>, %arg12: memref<1x32xf32, #tpu.memory_space<vmem>>, %arg13: memref<32x32xbf16, #tpu.memory_space<vmem>>, %arg14: memref<1x32xf32, #tpu.memory_space<vmem>>, %arg15: memref<32x1xbf16, #tpu.memory_space<vmem>>, %arg16: memref<1x1xf32, #tpu.memory_space<vmem>>, %arg17: memref<8x1xf32, #tpu.memory_space<vmem>>, %arg18: memref<8x32xf32, #tpu.memory_space<vmem>>) attributes {dimension_semantics = [#tpu.dimension_semantics<parallel>, #tpu.dimension_semantics<arbitrary>], iteration_bounds = array<i64: 1, 7>, scalar_prefetch = 0 : i64, scratch_operands = 1 : i64, tpu.core_type = #tpu.core_type<tc>, window_params = [{transform_indices = @transform_0, window_bounds = array<i64: 1, 8, 144>}, {pipeline_mode = #tpu.pipeline_mode<synchronous>, transform_indices = @transform_1, window_bounds = array<i64: 7, 144, 128>}, {pipeline_mode = #tpu.pipeline_mode<synchronous>, transform_indices = @transform_2, window_bounds = array<i64: 7, 1, 128>}, {pipeline_mode = #tpu.pipeline_mode<synchronous>, transform_indices = @transform_3, window_bounds = array<i64: 7, 1, 128>}, {pipeline_mode = #tpu.pipeline_mode<synchronous>, transform_indices = @transform_4, window_bounds = array<i64: 7, 1, 128>}, {pipeline_mode = #tpu.pipeline_mode<synchronous>, transform_indices = @transform_5, window_bounds = array<i64: 14, 128, 128>}, {pipeline_mode = #tpu.pipeline_mode<synchronous>, transform_indices = @transform_6, window_bounds = array<i64: 14, 1, 128>}, {pipeline_mode = #tpu.pipeline_mode<synchronous>, transform_indices = @transform_7, window_bounds = array<i64: 7, 128, 32>}, {pipeline_mode = #tpu.pipeline_mode<synchronous>, transform_indices = @transform_8, window_bounds = array<i64: 7, 1, 32>}, {pipeline_mode = #tpu.pipeline_mode<synchronous>, transform_indices = @transform_9, window_bounds = array<i64: 32, 32>}, {pipeline_mode = #tpu.pipeline_mode<synchronous>, transform_indices = @transform_10, window_bounds = array<i64: 1, 32>}, {pipeline_mode = #tpu.pipeline_mode<synchronous>, transform_indices = @transform_11, window_bounds = array<i64: 32, 32>}, {pipeline_mode = #tpu.pipeline_mode<synchronous>, transform_indices = @transform_12, window_bounds = array<i64: 1, 32>}, {pipeline_mode = #tpu.pipeline_mode<synchronous>, transform_indices = @transform_13, window_bounds = array<i64: 32, 1>}, {pipeline_mode = #tpu.pipeline_mode<synchronous>, transform_indices = @transform_14, window_bounds = array<i64: 1, 1>}, {transform_indices = @transform_15, window_bounds = array<i64: 8, 1>}]} {
    %c0_i32 = arith.constant 0 : i32
    %0 = arith.cmpi eq, %arg1, %c0_i32 : i32
    %1 = arith.extui %0 : i1 to i32
    %c0_i32_0 = arith.constant 0 : i32
    %2 = arith.cmpi ne, %1, %c0_i32_0 : i32
    scf.if %2 {
      %cst_57 = arith.constant 0.000000e+00 : f32
      %143 = vector.broadcast %cst_57 : f32 to vector<8x32xf32>
      %c0_58 = arith.constant 0 : index
      %c0_59 = arith.constant 0 : index
      %144 = vector.load %arg18[%c0_58, %c0_59] : memref<8x32xf32, #tpu.memory_space<vmem>>, vector<8x32xf32>
      tpu.vector_store %arg18[%c0_58, %c0_59], %143 {strides = array<i32>} : memref<8x32xf32, #tpu.memory_space<vmem>>, vector<8x32xf32>,
    } else {
    }
    %c0 = arith.constant 0 : index
    %c0_1 = arith.constant 0 : index
    %c0_2 = arith.constant 0 : index
    %3 = vector.load %arg2[%c0, %c0_1, %c0_2] : memref<1x8x144xf32, #tpu.memory_space<vmem>>, vector<1x8x144xf32>
    %4 = vector.shape_cast %3 : vector<1x8x144xf32> to vector<8x144xf32>
    %5 = arith.truncf %4 : vector<8x144xf32> to vector<8x144xbf16>
    %6 = arith.index_cast %arg1 : i32 to index
    %c0_3 = arith.constant 0 : index
    %c0_4 = arith.constant 0 : index
    %7 = vector.load %arg5[%6, %c0_3, %c0_4] : memref<7x1x128xf32, #tpu.memory_space<vmem>>, vector<1x1x128xf32>
    %8 = vector.shape_cast %7 : vector<1x1x128xf32> to vector<1x128xf32>
    %9 = arith.index_cast %arg1 : i32 to index
    %c0_5 = arith.constant 0 : index
    %c0_6 = arith.constant 0 : index
    %10 = vector.load %arg6[%9, %c0_5, %c0_6] : memref<7x1x128xf32, #tpu.memory_space<vmem>>, vector<1x1x128xf32>
    %11 = vector.shape_cast %10 : vector<1x1x128xf32> to vector<1x128xf32>
    %12 = arith.index_cast %arg1 : i32 to index
    %c0_7 = arith.constant 0 : index
    %c0_8 = arith.constant 0 : index
    %13 = vector.load %arg3[%12, %c0_7, %c0_8] : memref<7x144x128xbf16, #tpu.memory_space<vmem>>, vector<1x144x128xbf16>
    %14 = vector.shape_cast %13 : vector<1x144x128xbf16> to vector<144x128xbf16>
    %cst = arith.constant dense<0.000000e+00> : vector<8x128xf32>
    %15 = tpu.matmul %5, %14, %cst {dimension_numbers = #tpu.dot_dimension_numbers<[1], [0], [0], [1], [0, 0, 1, 1], [], []>} : vector<8x144xbf16>, vector<144x128xbf16>, vector<8x128xf32> -> vector<8x128xf32>
    %16 = arith.index_cast %arg1 : i32 to index
    %c0_9 = arith.constant 0 : index
    %c0_10 = arith.constant 0 : index
    %17 = vector.load %arg4[%16, %c0_9, %c0_10] : memref<7x1x128xf32, #tpu.memory_space<vmem>>, vector<1x1x128xf32>
    %18 = vector.shape_cast %17 : vector<1x1x128xf32> to vector<1x128xf32>
    %19 = vector.broadcast %18 : vector<1x128xf32> to vector<8x128xf32>
    %20 = arith.addf %15, %19 : vector<8x128xf32>
    %21 = vector.broadcast %8 : vector<1x128xf32> to vector<8x128xf32>
    %22 = arith.mulf %20, %21 : vector<8x128xf32>
    %23 = vector.broadcast %11 : vector<1x128xf32> to vector<8x128xf32>
    %24 = arith.addf %22, %23 : vector<8x128xf32>
    %cst_11 = arith.constant 2.000000e+01 : f32
    %25 = vector.broadcast %cst_11 : f32 to vector<8x128xf32>
    %26 = arith.minimumf %24, %25 : vector<8x128xf32>
    %27 = math.exp %26 : vector<8x128xf32>
    %cst_12 = arith.constant 1.000000e+00 : f32
    %28 = vector.broadcast %cst_12 : f32 to vector<8x128xf32>
    %29 = arith.addf %28, %27 : vector<8x128xf32>
    %cst_13 = arith.constant 1.000000e+00 : f32
    %30 = vector.broadcast %cst_13 : f32 to vector<8x128xf32>
    %31 = arith.addf %30, %27 : vector<8x128xf32>
    %32 = arith.mulf %29, %31 : vector<8x128xf32>
    %cst_14 = arith.constant 1.000000e+00 : f32
    %33 = vector.broadcast %cst_14 : f32 to vector<8x128xf32>
    %34 = arith.subf %32, %33 : vector<8x128xf32>
    %cst_15 = arith.constant 1.000000e+00 : f32
    %35 = vector.broadcast %cst_15 : f32 to vector<8x128xf32>
    %36 = arith.addf %32, %35 : vector<8x128xf32>
    %37 = tpu.reciprocal %36 {approx = true} : vector<8x128xf32> -> vector<8x128xf32>
    %38 = arith.mulf %34, %37 : vector<8x128xf32>
    %cst_16 = arith.constant 2.000000e+01 : f32
    %39 = vector.broadcast %cst_16 : f32 to vector<8x128xf32>
    %40 = arith.cmpf ogt, %24, %39 : vector<8x128xf32>
    %41 = arith.mulf %24, %38 : vector<8x128xf32>
    %42 = arith.select %40, %24, %41 : vector<8x128xi1>, vector<8x128xf32>
    %c2_i32 = arith.constant 2 : i32
    %43 = arith.muli %arg1, %c2_i32 : i32
    %c0_i32_17 = arith.constant 0 : i32
    %44 = arith.addi %43, %c0_i32_17 : i32
    %45 = arith.truncf %42 : vector<8x128xf32> to vector<8x128xbf16>
    %46 = arith.index_cast %44 : i32 to index
    %c0_18 = arith.constant 0 : index
    %c0_19 = arith.constant 0 : index
    %47 = vector.load %arg7[%46, %c0_18, %c0_19] : memref<14x128x128xbf16, #tpu.memory_space<vmem>>, vector<1x128x128xbf16>
    %48 = vector.shape_cast %47 : vector<1x128x128xbf16> to vector<128x128xbf16>
    %cst_20 = arith.constant dense<0.000000e+00> : vector<8x128xf32>
    %49 = tpu.matmul %45, %48, %cst_20 {dimension_numbers = #tpu.dot_dimension_numbers<[1], [0], [0], [1], [0, 0, 1, 1], [], []>} : vector<8x128xbf16>, vector<128x128xbf16>, vector<8x128xf32> -> vector<8x128xf32>
    %50 = arith.index_cast %44 : i32 to index
    %c0_21 = arith.constant 0 : index
    %c0_22 = arith.constant 0 : index
    %51 = vector.load %arg8[%50, %c0_21, %c0_22] : memref<14x1x128xf32, #tpu.memory_space<vmem>>, vector<1x1x128xf32>
    %52 = vector.shape_cast %51 : vector<1x1x128xf32> to vector<1x128xf32>
    %53 = vector.broadcast %52 : vector<1x128xf32> to vector<8x128xf32>
    %54 = arith.addf %49, %53 : vector<8x128xf32>
    %cst_23 = arith.constant 2.000000e+01 : f32
    %55 = vector.broadcast %cst_23 : f32 to vector<8x128xf32>
    %56 = arith.minimumf %54, %55 : vector<8x128xf32>
    %57 = math.exp %56 : vector<8x128xf32>
    %cst_24 = arith.constant 1.000000e+00 : f32
    %58 = vector.broadcast %cst_24 : f32 to vector<8x128xf32>
    %59 = arith.addf %58, %57 : vector<8x128xf32>
    %cst_25 = arith.constant 1.000000e+00 : f32
    %60 = vector.broadcast %cst_25 : f32 to vector<8x128xf32>
    %61 = arith.addf %60, %57 : vector<8x128xf32>
    %62 = arith.mulf %59, %61 : vector<8x128xf32>
    %cst_26 = arith.constant 1.000000e+00 : f32
    %63 = vector.broadcast %cst_26 : f32 to vector<8x128xf32>
    %64 = arith.subf %62, %63 : vector<8x128xf32>
    %cst_27 = arith.constant 1.000000e+00 : f32
    %65 = vector.broadcast %cst_27 : f32 to vector<8x128xf32>
    %66 = arith.addf %62, %65 : vector<8x128xf32>
    %67 = tpu.reciprocal %66 {approx = true} : vector<8x128xf32> -> vector<8x128xf32>
    %68 = arith.mulf %64, %67 : vector<8x128xf32>
    %cst_28 = arith.constant 2.000000e+01 : f32
    %69 = vector.broadcast %cst_28 : f32 to vector<8x128xf32>
    %70 = arith.cmpf ogt, %54, %69 : vector<8x128xf32>
    %71 = arith.mulf %54, %68 : vector<8x128xf32>
    %72 = arith.select %70, %54, %71 : vector<8x128xi1>, vector<8x128xf32>
    %73 = arith.addf %42, %72 : vector<8x128xf32>
    %c2_i32_29 = arith.constant 2 : i32
    %74 = arith.muli %arg1, %c2_i32_29 : i32
    %c1_i32 = arith.constant 1 : i32
    %75 = arith.addi %74, %c1_i32 : i32
    %76 = arith.truncf %73 : vector<8x128xf32> to vector<8x128xbf16>
    %77 = arith.index_cast %75 : i32 to index
    %c0_30 = arith.constant 0 : index
    %c0_31 = arith.constant 0 : index
    %78 = vector.load %arg7[%77, %c0_30, %c0_31] : memref<14x128x128xbf16, #tpu.memory_space<vmem>>, vector<1x128x128xbf16>
    %79 = vector.shape_cast %78 : vector<1x128x128xbf16> to vector<128x128xbf16>
    %cst_32 = arith.constant dense<0.000000e+00> : vector<8x128xf32>
    %80 = tpu.matmul %76, %79, %cst_32 {dimension_numbers = #tpu.dot_dimension_numbers<[1], [0], [0], [1], [0, 0, 1, 1], [], []>} : vector<8x128xbf16>, vector<128x128xbf16>, vector<8x128xf32> -> vector<8x128xf32>
    %81 = arith.index_cast %75 : i32 to index
    %c0_33 = arith.constant 0 : index
    %c0_34 = arith.constant 0 : index
    %82 = vector.load %arg8[%81, %c0_33, %c0_34] : memref<14x1x128xf32, #tpu.memory_space<vmem>>, vector<1x1x128xf32>
    %83 = vector.shape_cast %82 : vector<1x1x128xf32> to vector<1x128xf32>
    %84 = vector.broadcast %83 : vector<1x128xf32> to vector<8x128xf32>
    %85 = arith.addf %80, %84 : vector<8x128xf32>
    %cst_35 = arith.constant 2.000000e+01 : f32
    %86 = vector.broadcast %cst_35 : f32 to vector<8x128xf32>
    %87 = arith.minimumf %85, %86 : vector<8x128xf32>
    %88 = math.exp %87 : vector<8x128xf32>
    %cst_36 = arith.constant 1.000000e+00 : f32
    %89 = vector.broadcast %cst_36 : f32 to vector<8x128xf32>
    %90 = arith.addf %89, %88 : vector<8x128xf32>
    %cst_37 = arith.constant 1.000000e+00 : f32
    %91 = vector.broadcast %cst_37 : f32 to vector<8x128xf32>
    %92 = arith.addf %91, %88 : vector<8x128xf32>
    %93 = arith.mulf %90, %92 : vector<8x128xf32>
    %cst_38 = arith.constant 1.000000e+00 : f32
    %94 = vector.broadcast %cst_38 : f32 to vector<8x128xf32>
    %95 = arith.subf %93, %94 : vector<8x128xf32>
    %cst_39 = arith.constant 1.000000e+00 : f32
    %96 = vector.broadcast %cst_39 : f32 to vector<8x128xf32>
    %97 = arith.addf %93, %96 : vector<8x128xf32>
    %98 = tpu.reciprocal %97 {approx = true} : vector<8x128xf32> -> vector<8x128xf32>
    %99 = arith.mulf %95, %98 : vector<8x128xf32>
    %cst_40 = arith.constant 2.000000e+01 : f32
    %100 = vector.broadcast %cst_40 : f32 to vector<8x128xf32>
    %101 = arith.cmpf ogt, %85, %100 : vector<8x128xf32>
    %102 = arith.mulf %85, %99 : vector<8x128xf32>
    %103 = arith.select %101, %85, %102 : vector<8x128xi1>, vector<8x128xf32>
    %104 = arith.addf %73, %103 : vector<8x128xf32>
    %105 = vector.broadcast %8 : vector<1x128xf32> to vector<8x128xf32>
    %106 = arith.mulf %104, %105 : vector<8x128xf32>
    %107 = vector.broadcast %11 : vector<1x128xf32> to vector<8x128xf32>
    %108 = arith.addf %106, %107 : vector<8x128xf32>
    %cst_41 = arith.constant 2.000000e+01 : f32
    %109 = vector.broadcast %cst_41 : f32 to vector<8x128xf32>
    %110 = arith.minimumf %108, %109 : vector<8x128xf32>
    %111 = math.exp %110 : vector<8x128xf32>
    %cst_42 = arith.constant 1.000000e+00 : f32
    %112 = vector.broadcast %cst_42 : f32 to vector<8x128xf32>
    %113 = arith.addf %112, %111 : vector<8x128xf32>
    %cst_43 = arith.constant 1.000000e+00 : f32
    %114 = vector.broadcast %cst_43 : f32 to vector<8x128xf32>
    %115 = arith.addf %114, %111 : vector<8x128xf32>
    %116 = arith.mulf %113, %115 : vector<8x128xf32>
    %cst_44 = arith.constant 1.000000e+00 : f32
    %117 = vector.broadcast %cst_44 : f32 to vector<8x128xf32>
    %118 = arith.subf %116, %117 : vector<8x128xf32>
    %cst_45 = arith.constant 1.000000e+00 : f32
    %119 = vector.broadcast %cst_45 : f32 to vector<8x128xf32>
    %120 = arith.addf %116, %119 : vector<8x128xf32>
    %121 = tpu.reciprocal %120 {approx = true} : vector<8x128xf32> -> vector<8x128xf32>
    %122 = arith.mulf %118, %121 : vector<8x128xf32>
    %cst_46 = arith.constant 2.000000e+01 : f32
    %123 = vector.broadcast %cst_46 : f32 to vector<8x128xf32>
    %124 = arith.cmpf ogt, %108, %123 : vector<8x128xf32>
    %125 = arith.mulf %108, %122 : vector<8x128xf32>
    %126 = arith.select %124, %108, %125 : vector<8x128xi1>, vector<8x128xf32>
    %c0_47 = arith.constant 0 : index
    %c0_48 = arith.constant 0 : index
    %127 = vector.load %arg18[%c0_47, %c0_48] : memref<8x32xf32, #tpu.memory_space<vmem>>, vector<8x32xf32>
    %128 = arith.truncf %126 : vector<8x128xf32> to vector<8x128xbf16>
    %129 = arith.index_cast %arg1 : i32 to index
    %c0_49 = arith.constant 0 : index
    %c0_50 = arith.constant 0 : index
    %130 = vector.load %arg9[%129, %c0_49, %c0_50] : memref<7x128x32xbf16, #tpu.memory_space<vmem>>, vector<1x128x32xbf16>
    %131 = vector.shape_cast %130 : vector<1x128x32xbf16> to vector<128x32xbf16>
    %cst_51 = arith.constant dense<0.000000e+00> : vector<8x32xf32>
    %132 = tpu.matmul %128, %131, %cst_51 {dimension_numbers = #tpu.dot_dimension_numbers<[1], [0], [0], [1], [0, 0, 1, 1], [], []>} : vector<8x128xbf16>, vector<128x32xbf16>, vector<8x32xf32> -> vector<8x32xf32>
    %133 = arith.index_cast %arg1 : i32 to index
    %c0_52 = arith.constant 0 : index
    %c0_53 = arith.constant 0 : index
    %134 = vector.load %arg10[%133, %c0_52, %c0_53] : memref<7x1x32xf32, #tpu.memory_space<vmem>>, vector<1x1x32xf32>
    %135 = vector.shape_cast %134 : vector<1x1x32xf32> to vector<1x32xf32>
    %136 = vector.broadcast %135 : vector<1x32xf32> to vector<8x32xf32>
    %137 = arith.addf %132, %136 : vector<8x32xf32>
    %138 = arith.addf %127, %137 : vector<8x32xf32>
    %c0_54 = arith.constant 0 : index
    %c0_55 = arith.constant 0 : index
    %139 = vector.load %arg18[%c0_54, %c0_55] : memref<8x32xf32, #tpu.memory_space<vmem>>, vector<8x32xf32>
    tpu.vector_store %arg18[%c0_54, %c0_55], %138 {strides = array<i32>} : memref<8x32xf32, #tpu.memory_space<vmem>>, vector<8x32xf32>,
    %c6_i32 = arith.constant 6 : i32
    %140 = arith.cmpi eq, %arg1, %c6_i32 : i32
    %141 = arith.extui %140 : i1 to i32
    %c0_i32_56 = arith.constant 0 : i32
    %142 = arith.cmpi ne, %141, %c0_i32_56 : i32
    scf.if %142 {
      %c0_57 = arith.constant 0 : index
      %c0_58 = arith.constant 0 : index
      %143 = vector.load %arg18[%c0_57, %c0_58] : memref<8x32xf32, #tpu.memory_space<vmem>>, vector<8x32xf32>
      %144 = arith.truncf %143 : vector<8x32xf32> to vector<8x32xbf16>
      %c0_59 = arith.constant 0 : index
      %c0_60 = arith.constant 0 : index
      %145 = vector.load %arg11[%c0_59, %c0_60] : memref<32x32xbf16, #tpu.memory_space<vmem>>, vector<32x32xbf16>
      %cst_61 = arith.constant dense<0.000000e+00> : vector<8x32xf32>
      %146 = tpu.matmul %144, %145, %cst_61 {dimension_numbers = #tpu.dot_dimension_numbers<[1], [0], [0], [1], [0, 0, 1, 1], [], []>} : vector<8x32xbf16>, vector<32x32xbf16>, vector<8x32xf32> -> vector<8x32xf32>
      %c0_62 = arith.constant 0 : index
      %c0_63 = arith.constant 0 : index
      %147 = vector.load %arg12[%c0_62, %c0_63] : memref<1x32xf32, #tpu.memory_space<vmem>>, vector<1x32xf32>
      %148 = vector.broadcast %147 : vector<1x32xf32> to vector<8x32xf32>
      %149 = arith.addf %146, %148 : vector<8x32xf32>
      %cst_64 = arith.constant 0.000000e+00 : f32
      %cst_65 = arith.constant 1.000000e+00 : f32
      %150 = vector.broadcast %cst_64 : f32 to vector<8x32xf32>
      %151 = arith.maximumf %150, %149 : vector<8x32xf32>
      %152 = vector.broadcast %cst_65 : f32 to vector<8x32xf32>
      %153 = arith.minimumf %152, %151 : vector<8x32xf32>
      %154 = arith.truncf %153 : vector<8x32xf32> to vector<8x32xbf16>
      %c0_66 = arith.constant 0 : index
      %c0_67 = arith.constant 0 : index
      %155 = vector.load %arg13[%c0_66, %c0_67] : memref<32x32xbf16, #tpu.memory_space<vmem>>, vector<32x32xbf16>
      %cst_68 = arith.constant dense<0.000000e+00> : vector<8x32xf32>
      %156 = tpu.matmul %154, %155, %cst_68 {dimension_numbers = #tpu.dot_dimension_numbers<[1], [0], [0], [1], [0, 0, 1, 1], [], []>} : vector<8x32xbf16>, vector<32x32xbf16>, vector<8x32xf32> -> vector<8x32xf32>
      %c0_69 = arith.constant 0 : index
      %c0_70 = arith.constant 0 : index
      %157 = vector.load %arg14[%c0_69, %c0_70] : memref<1x32xf32, #tpu.memory_space<vmem>>, vector<1x32xf32>
      %158 = vector.broadcast %157 : vector<1x32xf32> to vector<8x32xf32>
      %159 = arith.addf %156, %158 : vector<8x32xf32>
      %cst_71 = arith.constant 0.000000e+00 : f32
      %cst_72 = arith.constant 1.000000e+00 : f32
      %160 = vector.broadcast %cst_71 : f32 to vector<8x32xf32>
      %161 = arith.maximumf %160, %159 : vector<8x32xf32>
      %162 = vector.broadcast %cst_72 : f32 to vector<8x32xf32>
      %163 = arith.minimumf %162, %161 : vector<8x32xf32>
      %164 = arith.truncf %163 : vector<8x32xf32> to vector<8x32xbf16>
      %c0_73 = arith.constant 0 : index
      %c0_74 = arith.constant 0 : index
      %165 = vector.load %arg15[%c0_73, %c0_74] : memref<32x1xbf16, #tpu.memory_space<vmem>>, vector<32x1xbf16>
      %cst_75 = arith.constant dense<0.000000e+00> : vector<8x1xf32>
      %166 = tpu.matmul %164, %165, %cst_75 {dimension_numbers = #tpu.dot_dimension_numbers<[1], [0], [0], [1], [0, 0, 1, 1], [], []>} : vector<8x32xbf16>, vector<32x1xbf16>, vector<8x1xf32> -> vector<8x1xf32>
      %c0_76 = arith.constant 0 : index
      %c0_77 = arith.constant 0 : index
      %167 = vector.load %arg16[%c0_76, %c0_77] : memref<1x1xf32, #tpu.memory_space<vmem>>, vector<1x1xf32>
      %168 = vector.broadcast %167 : vector<1x1xf32> to vector<8x1xf32>
      %169 = arith.addf %166, %168 : vector<8x1xf32>
      %c0_78 = arith.constant 0 : index
      %c0_79 = arith.constant 0 : index
      %170 = vector.load %arg17[%c0_78, %c0_79] : memref<8x1xf32, #tpu.memory_space<vmem>>, vector<8x1xf32>
      tpu.vector_store %arg17[%c0_78, %c0_79], %169 {strides = array<i32>} : memref<8x1xf32, #tpu.memory_space<vmem>>, vector<8x1xf32>,
    } else {
    }
    return
  }
  func.func @transform_0(%arg0: i32, %arg1: i32) -> (i32, i32, i32) {
    %c0_i32 = arith.constant 0 : i32
    %c0_i32_0 = arith.constant 0 : i32
    return %arg1, %arg0, %c0_i32 : i32, i32, i32
  }
  func.func @transform_1(%arg0: i32, %arg1: i32) -> (i32, i32, i32) {
    %c0_i32 = arith.constant 0 : i32
    %c0_i32_0 = arith.constant 0 : i32
    %c0_i32_1 = arith.constant 0 : i32
    %c0_i32_2 = arith.constant 0 : i32
    return %c0_i32, %c0_i32_0, %c0_i32_1 : i32, i32, i32
  }
  func.func @transform_2(%arg0: i32, %arg1: i32) -> (i32, i32, i32) {
    %c0_i32 = arith.constant 0 : i32
    %c0_i32_0 = arith.constant 0 : i32
    %c0_i32_1 = arith.constant 0 : i32
    %c0_i32_2 = arith.constant 0 : i32
    return %c0_i32, %c0_i32_0, %c0_i32_1 : i32, i32, i32
  }
  func.func @transform_3(%arg0: i32, %arg1: i32) -> (i32, i32, i32) {
    %c0_i32 = arith.constant 0 : i32
    %c0_i32_0 = arith.constant 0 : i32
    %c0_i32_1 = arith.constant 0 : i32
    %c0_i32_2 = arith.constant 0 : i32
    return %c0_i32, %c0_i32_0, %c0_i32_1 : i32, i32, i32
  }
  func.func @transform_4(%arg0: i32, %arg1: i32) -> (i32, i32, i32) {
    %c0_i32 = arith.constant 0 : i32
    %c0_i32_0 = arith.constant 0 : i32
    %c0_i32_1 = arith.constant 0 : i32
    %c0_i32_2 = arith.constant 0 : i32
    return %c0_i32, %c0_i32_0, %c0_i32_1 : i32, i32, i32
  }
  func.func @transform_5(%arg0: i32, %arg1: i32) -> (i32, i32, i32) {
    %c0_i32 = arith.constant 0 : i32
    %c0_i32_0 = arith.constant 0 : i32
    %c0_i32_1 = arith.constant 0 : i32
    %c0_i32_2 = arith.constant 0 : i32
    return %c0_i32, %c0_i32_0, %c0_i32_1 : i32, i32, i32
  }
  func.func @transform_6(%arg0: i32, %arg1: i32) -> (i32, i32, i32) {
    %c0_i32 = arith.constant 0 : i32
    %c0_i32_0 = arith.constant 0 : i32
    %c0_i32_1 = arith.constant 0 : i32
    %c0_i32_2 = arith.constant 0 : i32
    return %c0_i32, %c0_i32_0, %c0_i32_1 : i32, i32, i32
  }
  func.func @transform_7(%arg0: i32, %arg1: i32) -> (i32, i32, i32) {
    %c0_i32 = arith.constant 0 : i32
    %c0_i32_0 = arith.constant 0 : i32
    %c0_i32_1 = arith.constant 0 : i32
    %c0_i32_2 = arith.constant 0 : i32
    return %c0_i32, %c0_i32_0, %c0_i32_1 : i32, i32, i32
  }
  func.func @transform_8(%arg0: i32, %arg1: i32) -> (i32, i32, i32) {
    %c0_i32 = arith.constant 0 : i32
    %c0_i32_0 = arith.constant 0 : i32
    %c0_i32_1 = arith.constant 0 : i32
    %c0_i32_2 = arith.constant 0 : i32
    return %c0_i32, %c0_i32_0, %c0_i32_1 : i32, i32, i32
  }
  func.func @transform_9(%arg0: i32, %arg1: i32) -> (i32, i32) {
    %c0_i32 = arith.constant 0 : i32
    %c0_i32_0 = arith.constant 0 : i32
    %c0_i32_1 = arith.constant 0 : i32
    return %c0_i32, %c0_i32_0 : i32, i32
  }
  func.func @transform_10(%arg0: i32, %arg1: i32) -> (i32, i32) {
    %c0_i32 = arith.constant 0 : i32
    %c0_i32_0 = arith.constant 0 : i32
    %c0_i32_1 = arith.constant 0 : i32
    return %c0_i32, %c0_i32_0 : i32, i32
  }
  func.func @transform_11(%arg0: i32, %arg1: i32) -> (i32, i32) {
    %c0_i32 = arith.constant 0 : i32
    %c0_i32_0 = arith.constant 0 : i32
    %c0_i32_1 = arith.constant 0 : i32
    return %c0_i32, %c0_i32_0 : i32, i32
  }
  func.func @transform_12(%arg0: i32, %arg1: i32) -> (i32, i32) {
    %c0_i32 = arith.constant 0 : i32
    %c0_i32_0 = arith.constant 0 : i32
    %c0_i32_1 = arith.constant 0 : i32
    return %c0_i32, %c0_i32_0 : i32, i32
  }
  func.func @transform_13(%arg0: i32, %arg1: i32) -> (i32, i32) {
    %c0_i32 = arith.constant 0 : i32
    %c0_i32_0 = arith.constant 0 : i32
    %c0_i32_1 = arith.constant 0 : i32
    return %c0_i32, %c0_i32_0 : i32, i32
  }
  func.func @transform_14(%arg0: i32, %arg1: i32) -> (i32, i32) {
    %c0_i32 = arith.constant 0 : i32
    %c0_i32_0 = arith.constant 0 : i32
    %c0_i32_1 = arith.constant 0 : i32
    return %c0_i32, %c0_i32_0 : i32, i32
  }
  func.func @transform_15(%arg0: i32, %arg1: i32) -> (i32, i32) {
    %c0_i32 = arith.constant 0 : i32
    %c0_i32_0 = arith.constant 0 : i32
    return %arg0, %c0_i32 : i32, i32
  }
}

</mosaic_0001>

<bundles_post_ra>
// kernel: tpu_custom_call.1
= control target key start
LH: loop header
LB: loop body
LE: loop exit
PB: predicated region body
PF: predicated region fallthrough
CT: control target
= control target key end

     0   :  { %s2220_s0 = inlined_call_operand.hbm [shape: f32[7,8,144], index: 0, kind: input, shape index: {}]   ;;  %s2221_s1 = inlined_call_operand.vmem [shape: bf16[7,144,128], index: 1, kind: input, shape index: {}]   ;;  %s2222_s2 = inlined_call_operand.vmem [shape: f32[7,1,128], index: 2, kind: input, shape index: {}]   ;;  %s2223_s3 = inlined_call_operand.vmem [shape: f32[7,1,128], index: 3, kind: input, shape index: {}]   ;;  %s2224_s4 = inlined_call_operand.vmem [shape: f32[7,1,128], index: 4, kind: input, shape index: {}]   ;;  %s2225_s5 = inlined_call_operand.hbm [shape: bf16[14,128,128], index: 5, kind: input, shape index: {}]   ;;  %s2226_s6 = inlined_call_operand.vmem [shape: f32[14,1,128], index: 6, kind: input, shape index: {}]   ;;  %s2227_s7 = inlined_call_operand.vmem [shape: bf16[7,128,32], index: 7, kind: input, shape index: {}]   ;;  %s2228_s8 = inlined_call_operand.vmem [shape: f32[7,1,32], index: 8, kind: input, shape index: {}]   ;;  %s2229_s9 = inlined_call_operand.vmem [shape: bf16[32,32], index: 9, kind: input, shape index: {}]   ;;  %s2230_s10 = inlined_call_operand.vmem [shape: f32[1,32], index: 10, kind: input, shape index: {}]   ;;  %s2231_s11 = inlined_call_operand.vmem [shape: bf16[32,32], index: 11, kind: input, shape index: {}]   ;;  %s2232_s12 = inlined_call_operand.vmem [shape: f32[1,32], index: 12, kind: input, shape index: {}]   ;;  %s2233_s13 = inlined_call_operand.vmem [shape: bf16[32,1], index: 13, kind: input, shape index: {}]   ;;  %s2234_s14 = inlined_call_operand.<no memory space> [shape: f32[1,1], index: 14, kind: input, shape index: {}]   ;;  %s2235_s15 = inlined_call_operand.vmem [shape: f32[8,1], index: 15, kind: output, shape index: {}]  }
   0x1   :  { %2239 = sst [smem:[#allocation10_spill]] %s2225_s5  ;;  %v20_v0 = vstv %s2234_s14 }
   0x2   :  { %2240 = sst [smem:[#allocation11_spill]] %s2229_s9  ;;  %21 = vst [vmem:[#allocation3] sm:$0x1] %v20_v0 }
   0x3   :  { %2241 = sst [smem:[#allocation12_spill]] %s2230_s10 }
   0x4   :  { %2242 = sst [smem:[#allocation13_spill]] %s2231_s11 }
   0x5   :  { %2243 = sst [smem:[#allocation14_spill]] %s2232_s12 }
   0x6   :  { %2244 = sst [smem:[#allocation15_spill]] %s2233_s13 }
   0x7   :  { %2245 = sst [smem:[#allocation16_spill]] %s2235_s15 }
   0x8   :  { %22 = vsyncpa [#allocation5], 0 }
   0x9   :  { %24 = vsyncpa [#allocation5 + $0x1], 0 }
   0xa   :  { %25 = vsyncpa [#allocation7], 0  ;;  %s1975_s20 = smov 0   ;;  %s1977_s21 = smov 0  }
   0xb   :  { %s1979_s22 = smov 0   ;;  %s1981_s23 = smov 0  }
   0xc   :  { %s1983_s24 = smov 0   ;;  %s1985_s25 = smov 0  }
   0xd LB: > { %s1420_s14 = sadd.s32 4294967295, %s1880_s25   ;;  %p65_p0 = scmp.ne.s32.totalorder %s1864_s21, %s1860_s20  ;;  %s1880_s25 = sphi %s1985_s25, %s31_s25   ;;  %s1876_s24 = sphi %s1983_s24, %s2262_s24   ;;  %s1872_s23 = sphi %s1981_s23, %s2261_s23   ;;  %s1868_s22 = sphi %s1979_s22, %s2260_s22   ;;  %s1864_s21 = sphi %s1977_s21, %s2259_s21   ;;  %s1860_s20 = sphi %s1975_s20, %s2258_s20  }
   0xe   : > { %p2005_p1 = scmp.eq.s32.totalorder %s1420_s14, 0  ;;  %p1421_p2 = scmp.ge.s32.totalorder %s1880_s25, 1 }
   0xf   : > { %p396_p3 = scmp.lt.s32.totalorder %s1880_s25, 8  ;;  %s1882_s29 = smov [#allocation6]  }
  0x10   : > { %p2013_p4 = por %p2005_p1, %p65_p0  ;;  %s420_s30 = sshll.u32 %s1882_s29, 4  ;;  %s421_s30 = int_to_ptr.vmem [resolvable:$true] %s420_s30 }
  0x11   : > { %p2017_p5 = pnand %p1421_p2, %p396_p3  ;;  %s40_s17 = sadd.s32 1, %s1876_s24 }
  0x12   : > { %s1783_s18 = scalar_lea.vmem %s421_s30, 14336  ;;  %p1791_p12 = scmp.lt.s32.totalorder %s421_s30, %s421_s30 }
  0x13   : > { %p1649_p6 = pneg %p2017_p5  ;;  %p1784_p9 = scmp.ne.s32.totalorder %s421_s30, %s1783_s18 }
  0x14   : > { %p1792_p13 = scmp.lt.s32.totalorder %s1783_s18, %s1783_s18 }
  0x15   : > { %p2025_p7 = pnand %p1649_p6, %p2005_p1 }
  0x16   : > { %p1793_p0 = por %p1792_p13, %p1791_p12 }
  0x17   : > { %p1774_p8 = pneg %p2025_p7 }
  0x19   : > { %p1786_p10 = pnand %p1784_p9, %p1774_p8 }
  0x1b   : > { %p1787_p11 = pneg %p1786_p10 }
  0x1d   : > { %p1794_p2 = pnand %p1793_p0, %p1787_p11 }
  0x1f   : > { %1797 = shalt.err (!%p1794_p2)
}
  0x20   : > { %s1883_s19 = smov 64   ;;  %s1884_s20 = smov 4  }
  0x21   : > { %s2250_s5 = sld [smem:[#allocation10_spill]]  ;;  %p41_p3 = scmp.ge.s32.totalorder %s40_s17, 7 }
  0x22   : > { %s52_s18 = sadd.s32 1, %s1868_s22  ;;  %p59_p6 = scmp.ne.s32.totalorder %s1868_s22, %s1864_s21 }
  0x23   : > { %p60_p8 = scmp.eq.s32.totalorder %s1880_s25, 0  ;;  %s2264_s17 = smov (%p41_p3, %s40_s17), 0 }
  0x24   : > { %p1658_p10 = scmp.lt.s32.totalorder %s1880_s25, 7  ;;  %s47_s15 = ssub.s32 %s1876_s24, %s2264_s17 }
  0x25   : > { %p61_p9 = por %p60_p8, %p59_p6  ;;  %s461_s12 = sand.u32 1, %s1868_s22  }
  0x26   : > { %p50_p11 = scmp.eq.s32.totalorder %s47_s15, 0  ;;  %s1424_s13 = sshll.u32 %s461_s12, 4 }
  0x27   : > { %1652 = dma.hbm_to_vmem [thread:$0]  (!%p2025_p7), %s2250_s5, 14336, %s421_s30, [#allocation7], %s1883_s19, %s1883_s19, %s1884_s20  }
  0x28   : > { %s1517_s10 = sshll.u32 %s1876_s24, 8  ;;  %s465_s19 = scalar_lea.vmem [#allocation4], %s1424_s13 }
  0x29   : > { %s2049_s11 = scalar_select %p50_p11, %s1868_s22, %s52_s18  }
  0x2a   : > { %s473_s30 = scalar_lea.hbm %s2220_s0, %s1517_s10  ;;  %s475_s20 = sshll.u32 %s465_s19, 4  ;;  %s476_s20 = int_to_ptr.vmem [resolvable:$true] %s475_s20 }
  0x2b   : > { %p2054_p7 = pnand %p1658_p10, %p61_p9  ;;  %s462_s29 = scalar_lea.sflag [#allocation5], %s461_s12 }
  0x2c   : > { %s1811_s15 = scalar_lea.vmem %s476_s20, 256  ;;  %s1885_s18 = smov [#allocation4]  }
  0x2d   : > { %p1800_p12 = pneg %p2054_p7  ;;  %p1812_p13 = scmp.ne.s32.totalorder %s476_s20, %s1811_s15 }
  0x2e   : > { %s1816_s5 = sshll.u32 %s1885_s18, 4  ;;  %s1817_s5 = int_to_ptr.vmem [resolvable:$false] %s1816_s5 }
  0x2f   : > { %p1814_p0 = pnand %p1812_p13, %p1800_p12  ;;  %s1818_s9 = scalar_lea.vmem %s1817_s5, 512 }
  0x30   : > { %p1819_p3 = scmp.lt.s32.totalorder %s476_s20, %s1817_s5  ;;  %p1820_p6 = scmp.lt.s32.totalorder %s1818_s9, %s1811_s15 }
  0x31   : > { %p1815_p2 = pneg %p1814_p0 }
  0x32   : > { %p1821_p8 = por %p1820_p6, %p1819_p3 }
  0x34   : > { %p1822_p9 = pnand %p1821_p8, %p1815_p2 }
  0x36   : > { %1825 = shalt.err (!%p1822_p9)
}
  0x37   : > { %1656 = dma.hbm_to_vmem [thread:$0]  (!%p2054_p7), %s473_s30, 256, %s476_s20, %s462_s29  }
  0x38   : > { %484 = sbr.rel (%p2017_p5) target bundleno = 1696 (0x6a0), region = 80  ;;  %s486_s10 = sand.u32 (!%p2017_p5), 1, %s1864_s21  }
  0x39   : > { %s2065_s12 = sshll.u32 (!%p2017_p5), %s486_s10, 4  ;;  %s487_s13 = scalar_lea.sflag (!%p2017_p5), [#allocation5], %s486_s10 }
  0x3a   : > { %s490_s16 = scalar_lea.vmem (!%p2017_p5), [#allocation4], %s2065_s12 }
  0x3d   : > { %1851 = dma.done.wait (%p2013_p4), %s487_s13, 256  }
  0x3e   : > { %1853 = vsyncadd (%p2013_p4), %s487_s13, 4294967040 }
  0x3f   : > { %1855 = dma.done.wait (%p2005_p1), [#allocation7], 14336  }
  0x40   : > { %1857 = vsyncadd (%p2005_p1), [#allocation7], 4294952960  ;;  %p1430_p5 = scmp.ne.s32.totalorder %s1872_s23, 0 }
  0x42   : > { %548 = sbr.rel (%p1430_p5) target bundleno = 73 (0x49), region = 92 }
  0x47   : > { %vm549_vm0 = vcmask 261120   ;;  %v1886_v1 = vmov 0.0  }
  0x48   : > { %550 = vst.msk [vmem:[#allocation2] sm:$0xff] %vm549_vm0, %v1886_v1 }
  0x49 PF: > { %s1518_s5 = smul.u32 72, %s1872_s23  ;;  %v552_v2 = vld [vmem:[%s490_s16 + $0x8] sm:$0xff]  ;;  %vm642_vm1 = vcmask 130048   ;;  %v1887_v3 = vmov 0   ;;  %v551_v14 = vld [vmem:[%s490_s16] sm:$0xff]  ;;  %s1520_s30 = sshll.u32 %s1872_s23, 7 }
  0x4a   : > { %646 = vmatprep.subr.bf16.mxu0 %v1887_v3  ;;  %v554_v4 = vpack.c.bf16 %v552_v2, %v552_v2  ;;  %v553_v15 = vpack.c.bf16 %v551_v14, %v551_v14  ;;  %v1888_v16 = vmov 0.0   ;;  %vm1889_vm2 = vmmov 0   ;;  %s2089_s19 = scalar_lea.vmem [#allocation6], %s1520_s30  ;;  %s580_s29 = scalar_lea.vmem %s2222_s2, %s1872_s23 }
  0x4b   : > { %s561_s26 = scalar_lea.vmem %s2221_s1, %s1518_s5  ;;  %1559 = vmatprep.subr.bf16.mxu1 %v1888_v16  ;;  %1575 = vmatprep.mubr.msk.bf16.mxu1 %vm1889_vm2, %v1888_v16  ;;  %v1726_v17 = vld [vmem:[%s2089_s19 + $0x38] sm:$0xff]   ;;  %v1727_v18 = vld [vmem:[%s2089_s19 + $0x30] sm:$0xff]   ;;  %v1728_v19 = vld [vmem:[%s2089_s19 + $0x28] sm:$0xff]   ;;  %s555_s9 = scalar_lea.vmem %s2223_s3, %s1872_s23  ;;  %vm1104_vm7 = vcmask 261120  }
  0x4c   : > { %v1717_v5 = vld [vmem:[%s561_s26 + $0x38] sm:$0xff]   ;;  %1442 = vmatprep.mubr.msk.bf16.mxu0 %vm642_vm1, %v554_v4  ;;  %v1718_v6 = vld [vmem:[%s561_s26 + $0x30] sm:$0xff]   ;;  %v1719_v7 = vld [vmem:[%s561_s26 + $0x28] sm:$0xff]   ;;  %1560 = vmatpush3.bf16.msra.mxu1 %v1726_v17  ;;  %s557_s13 = scalar_lea.vmem %s2224_s4, %s1872_s23  ;;  %s1446_s16 = sshll.u32 %s1872_s23, 1 }
  0x4d   : > { %647 = vmatpush1.bf16.msra.mxu0 %v1717_v5  ;;  %v1720_v8 = vld [vmem:[%s561_s26 + $0x20] sm:$0xff]   ;;  %v1721_v9 = vld [vmem:[%s561_s26 + $0x18] sm:$0xff]   ;;  %v1722_v10 = vld [vmem:[%s561_s26 + $0x10] sm:$0xff]   ;;  %1561 = vmatprep.subr.bf16.mxu1 %v1888_v16  ;;  %s2149_s28 = scalar_lea.vmem %s2226_s6, %s1446_s16  ;;  %s1007_s15 = scalar_lea.vmem %s2228_s8, %s1872_s23 }
  0x4e   : > { %648 = vmatprep.subr.bf16.mxu0 %v1887_v3  ;;  %v1723_v11 = vld [vmem:[%s561_s26 + $0x8] sm:$0xff]   ;;  %v1724_v12 = vld [vmem:[%s561_s26] sm:$0xff]   ;;  %v1730_v21 = vld [vmem:[%s2089_s19 + $0x18] sm:$0xff]   ;;  %p1501_p1 = scmp.ne.s32.totalorder %s1872_s23, 6 }
  0x4f   : > { %v1725_v13 = vld [vmem:[%s561_s26 + $0x40] sm:$0xff]   ;;  %v1731_v22 = vld [vmem:[%s2089_s19 + $0x10] sm:$0xff]   ;;  %v1732_v23 = vld [vmem:[%s2089_s19 + $0x8] sm:$0xff]   ;;  %s1522_s26 = sshll.u32 %s1872_s23, 6  ;;  %s2252_s10 = sld [smem:[#allocation11_spill]] (!%p1501_p1) }
  0x50   : > { %1562 = vmatpush3.bf16.msra.mxu1 %v1727_v18  ;;  %v1729_v20 = vld [vmem:[%s2089_s19 + $0x20] sm:$0xff]   ;;  %v1734_v47 = vld [vmem:[%s2089_s19 + $0x78] sm:$0xff]   ;;  %v1735_v48 = vld [vmem:[%s2089_s19 + $0x70] sm:$0xff]   ;;  %s990_s20 = scalar_lea.vmem %s2227_s7, %s1522_s26  ;;  %s2253_s5 = sld [smem:[#allocation13_spill]] (!%p1501_p1) }
  0x51   : > { %649 = vmatpush1.bf16.msra.mxu0 %v1718_v6  ;;  %1563 = vmatprep.subr.bf16.mxu1 %v1888_v16  ;;  %v1733_v24 = vld [vmem:[%s2089_s19] sm:$0xff]   ;;  %v1736_v49 = vld [vmem:[%s2089_s19 + $0x68] sm:$0xff]   ;;  %v1738_v51 = vld [vmem:[%s2089_s19 + $0x58] sm:$0xff]   ;;  %s2257_s27 = sld [smem:[#allocation16_spill]] (!%p1501_p1) }
  0x52   : > { %650 = vmatprep.subr.bf16.mxu0 %v1887_v3  ;;  %v1432_v25 = vld [vmem:[%s580_s29] ss:$0 sm:$0xff]  ;;  %v1739_v52 = vld [vmem:[%s2089_s19 + $0x50] sm:$0xff]   ;;  %v1740_v53 = vld [vmem:[%s2089_s19 + $0x48] sm:$0xff]   ;;  %s2255_s29 = sld [smem:[#allocation15_spill]] (!%p1501_p1) }
  0x53   : > { %v2122_v26 = vld [vmem:[%s555_s9] ss:$0 sm:$0xff]  ;;  %v1746_v14 = vld [vmem:[%s990_s20 + $0x18] sm:$0xff]   ;;  %v1748_v17 = vld [vmem:[%s990_s20 + $0x8] sm:$0xff]  }
  0x54   : > { %1564 = vmatpush3.bf16.msra.mxu1 %v1728_v19  ;;  %v2124_v29 = vld [vmem:[%s557_s13] ss:$0 sm:$0xff]  ;;  %v1479_v19 = vld [vmem:[%s2149_s28 + $0x1] ss:$0 sm:$0xff]  ;;  %s2256_s13 = sld [smem:[#allocation14_spill]] (!%p1501_p1) }
  0x55   : > { %651 = vmatpush1.bf16.msra.mxu0 %v1719_v7  ;;  %1565 = vmatprep.subr.bf16.mxu1 %v1888_v16  ;;  %v1737_v50 = vld [vmem:[%s2089_s19 + $0x60] sm:$0xff]  }
  0x56   : > { %652 = vmatprep.subr.bf16.mxu0 %v1887_v3  ;;  %v1741_v54 = vld [vmem:[%s2089_s19 + $0x40] sm:$0xff]   ;;  %s2254_s19 = sld [smem:[#allocation12_spill]] (!%p1501_p1) }
  0x57   : > { %v1449_v55 = vld [vmem:[%s2149_s28] ss:$0 sm:$0xff] }
  0x58   : > { %1566 = vmatpush3.bf16.msra.mxu1 %v1729_v20  ;;  %v1749_v18 = vld [vmem:[%s990_s20] sm:$0xff]  }
  0x59   : > { %653 = vmatpush1.bf16.msra.mxu0 %v1720_v8  ;;  %1567 = vmatprep.subr.bf16.mxu1 %v1888_v16 }
  0x5a   : > { %654 = vmatprep.subr.bf16.mxu0 %v1887_v3 }
  0x5c   : > { %1568 = vmatpush3.bf16.msra.mxu1 %v1730_v21 }
  0x5d   : > { %655 = vmatpush1.bf16.msra.mxu0 %v1721_v9  ;;  %1569 = vmatprep.subr.bf16.mxu1 %v1888_v16 }
  0x5e   : > { %656 = vmatprep.subr.bf16.mxu0 %v1887_v3 }
  0x60   : > { %1570 = vmatpush3.bf16.msra.mxu1 %v1731_v22 }
  0x61   : > { %657 = vmatpush1.bf16.msra.mxu0 %v1722_v10  ;;  %1571 = vmatprep.subr.bf16.mxu1 %v1888_v16  ;;  %v1742_v10 = vld [vmem:[%s990_s20 + $0x38] sm:$0xff]  }
  0x62   : > { %658 = vmatprep.subr.bf16.mxu0 %v1887_v3 }
  0x64   : > { %1572 = vmatpush3.bf16.msra.mxu1 %v1732_v23 }
  0x65   : > { %659 = vmatpush1.bf16.msra.mxu0 %v1723_v11  ;;  %1573 = vmatprep.subr.bf16.mxu1 %v1888_v16  ;;  %v1743_v11 = vld [vmem:[%s990_s20 + $0x30] sm:$0xff]  }
  0x66   : > { %660 = vmatprep.subr.bf16.mxu0 %v1887_v3 }
  0x68   : > { %1574 = vmatpush3.bf16.msra.mxu1 %v1733_v24 }
  0x69   : > { %661 = vmatpush1.bf16.msra.mxu0 %v1724_v12  ;;  %1579 = vmatprep.subr.bf16.mxu1 %v1888_v16  ;;  %v1744_v12 = vld [vmem:[%s990_s20 + $0x28] sm:$0xff]  }
  0x6a   : > { %676 = vmatprep.subr.bf16.mxu0 %v1887_v3 }
  0x6d   : > { %677 = vmatpush2.bf16.msra.mxu0 %v1725_v13  ;;  %v1745_v13 = vld [vmem:[%s990_s20 + $0x20] sm:$0xff]  }
  0x6e   : > { %1599 = vmatprep.subr.bf16.mxu0 %v1888_v16 }
  0x70   : > { %679 = vmatmul.mubr.bf16.vlgmr.msra.gmra.mxu0 %v553_v15  ;;  %v1747_v15 = vld [vmem:[%s990_s20 + $0x10] sm:$0xff]  }
  0x71   : > { %1615 = vmatprep.mubr.msk.bf16.mxu0 %vm1889_vm2, %v1888_v16  ;;  %1600 = vmatpush3.bf16.msra.mxu0 %v1742_v10 }
  0x72   : > { %1601 = vmatprep.subr.bf16.mxu0 %v1888_v16 }
  0x75   : > { %1602 = vmatpush3.bf16.msra.mxu0 %v1743_v11 }
  0x76   : > { %1603 = vmatprep.subr.bf16.mxu0 %v1888_v16 }
  0x79   : > { %1604 = vmatpush3.bf16.msra.mxu0 %v1744_v12 }
  0x7a   : > { %1605 = vmatprep.subr.bf16.mxu0 %v1888_v16 }
  0x7d   : > { %1606 = vmatpush3.bf16.msra.mxu0 %v1745_v13 }
  0x7e   : > { %1607 = vmatprep.subr.bf16.mxu0 %v1888_v16 }
  0x81   : > { %1608 = vmatpush3.bf16.msra.mxu0 %v1746_v14 }
  0x82   : > { %1609 = vmatprep.subr.bf16.mxu0 %v1888_v16 }
  0x85   : > { %1610 = vmatpush3.bf16.msra.mxu0 %v1747_v15 }
  0x86   : > { %1611 = vmatprep.subr.bf16.mxu0 %v1888_v16 }
  0x89   : > { %1612 = vmatpush3.bf16.msra.mxu0 %v1748_v17 }
  0x8a   : > { %1613 = vmatprep.subr.bf16.mxu0 %v1888_v16 }
  0x8d   : > { %1614 = vmatpush3.bf16.msra.mxu0 %v1749_v18 }
 0x130   : > { %v680_v27 = vpop.f32.mrf.mxu0 }
 0x131   : > { %v681_v28 = vadd.f32 %v1432_v25, %v680_v27 }
 0x132   : > { %v682_v30 = vpop.f32.mrf.mxu0 }
 0x133   : > { %v692_v31 = vmul.f32 %v2122_v26, %v681_v28 }
 0x134   : > { %v683_v32 = vpop.f32.mrf.mxu0 }
 0x135   : > { %v699_v33 = vadd.f32 %v2124_v29, %v692_v31 }
 0x136   : > { %v684_v34 = vpop.f32.mrf.mxu0 }
 0x137   : > { %v700_v35 = vmin.f32 %v699_v33, 20.0  ;;  %vm709_vm3 = vcmp.gt.f32.partialorder %v699_v33, 20.0 }
 0x139   : > { %v701_v36 = vmul.f32 1.442695, %v700_v35 }
 0x13b   : > { %1750 = vpow2.f32 %v701_v36 }
 0x148   : > { %v1751_v37 = vpop.eup %1750 }
 0x149   : > { %v703_v38 = vadd.f32 1.0, %v1751_v37 }
 0x14b   : > { %v704_v39 = vmul.f32 %v703_v38, %v703_v38 }
 0x14d   : > { %v706_v40 = vadd.f32 1.0, %v704_v39  ;;  %v1445_v41 = vadd.f32 -1.0, %v704_v39 }
 0x14f   : > { %1752 = vrcp.f32 %v706_v40 }
 0x15c   : > { %v1753_v42 = vpop.eup %1752 }
 0x15d   : > { %v708_v43 = vmul.f32 %v1753_v42, %v1445_v41 }
 0x15f   : > { %v710_v44 = vmul.f32 %v708_v43, %v699_v33 }
 0x161   : > { %v711_v45 = vsel %vm709_vm3, %v699_v33, %v710_v44 }
 0x162   : > { %v713_v46 = vpack.c.bf16 %v711_v45, %v711_v45 }
 0x164   : > { %1576 = vmatmul.mubr.bf16.vlgmr.msra.gmra.mxu1 %v713_v46 }
 0x165   : > { %1595 = vmatprep.mubr.msk.bf16.mxu1 %vm1889_vm2, %v1888_v16  ;;  %1580 = vmatpush3.bf16.msra.mxu1 %v1734_v47 }
 0x166   : > { %1581 = vmatprep.subr.bf16.mxu1 %v1888_v16 }
 0x169   : > { %1582 = vmatpush3.bf16.msra.mxu1 %v1735_v48 }
 0x16a   : > { %1583 = vmatprep.subr.bf16.mxu1 %v1888_v16 }
 0x16d   : > { %1584 = vmatpush3.bf16.msra.mxu1 %v1736_v49 }
 0x16e   : > { %1585 = vmatprep.subr.bf16.mxu1 %v1888_v16 }
 0x171   : > { %1586 = vmatpush3.bf16.msra.mxu1 %v1737_v50 }
 0x172   : > { %1587 = vmatprep.subr.bf16.mxu1 %v1888_v16 }
 0x175   : > { %1588 = vmatpush3.bf16.msra.mxu1 %v1738_v51 }
 0x176   : > { %1589 = vmatprep.subr.bf16.mxu1 %v1888_v16 }
 0x179   : > { %1590 = vmatpush3.bf16.msra.mxu1 %v1739_v52 }
 0x17a   : > { %1591 = vmatprep.subr.bf16.mxu1 %v1888_v16 }
 0x17d   : > { %1592 = vmatpush3.bf16.msra.mxu1 %v1740_v53 }
 0x17e   : > { %1593 = vmatprep.subr.bf16.mxu1 %v1888_v16 }
 0x181   : > { %1594 = vmatpush3.bf16.msra.mxu1 %v1741_v54 }
 0x224   : > { %v823_v56 = vpop.f32.mrf.mxu1 }
 0x225   : > { %v824_v57 = vadd.f32 %v1449_v55, %v823_v56 }
 0x226   : > { %v1577_v58 = vpop.f32.mrf.mxu1 }
 0x227   : > { %v829_v59 = vmin.f32 %v824_v57, 20.0  ;;  %vm838_vm4 = vcmp.gt.f32.partialorder %v824_v57, 20.0 }
 0x228   : > { %v826_v60 = vpop.f32.mrf.mxu1 }
 0x229   : > { %v830_v61 = vmul.f32 1.442695, %v829_v59 }
 0x22a   : > { %v1578_v62 = vpop.f32.mrf.mxu1 }
 0x22b   : > { %1754 = vpow2.f32 %v830_v61 }
 0x238   : > { %v1755_v63 = vpop.eup %1754 }
 0x239   : > { %v832_v0 = vadd.f32 1.0, %v1755_v63 }
 0x23b   : > { %v833_v1 = vmul.f32 %v832_v0, %v832_v0 }
 0x23d   : > { %v835_v2 = vadd.f32 1.0, %v833_v1  ;;  %v1458_v3 = vadd.f32 -1.0, %v833_v1 }
 0x23f   : > { %1756 = vrcp.f32 %v835_v2 }
 0x24c   : > { %v1757_v4 = vpop.eup %1756 }
 0x24d   : > { %v837_v5 = vmul.f32 %v1757_v4, %v1458_v3 }
 0x24f   : > { %v839_v6 = vmul.f32 %v837_v5, %v824_v57 }
 0x251   : > { %v840_v7 = vsel %vm838_vm4, %v824_v57, %v839_v6 }
 0x252   : > { %v841_v8 = vadd.f32 %v840_v7, %v711_v45 }
 0x254   : > { %v843_v9 = vpack.c.bf16 %v841_v8, %v841_v8 }
 0x256   : > { %1596 = vmatmul.mubr.bf16.vlgmr.msra.gmra.mxu1 %v843_v9 }
 0x316   : > { %v953_v20 = vpop.f32.mrf.mxu1 }
 0x317   : > { %v954_v21 = vadd.f32 %v1479_v19, %v953_v20 }
 0x318   : > { %v1597_v22 = vpop.f32.mrf.mxu1 }
 0x319   : > { %v959_v23 = vmin.f32 %v954_v21, 20.0  ;;  %vm968_vm5 = vcmp.gt.f32.partialorder %v954_v21, 20.0 }
 0x31a   : > { %v956_v24 = vpop.f32.mrf.mxu1 }
 0x31b   : > { %v960_v25 = vmul.f32 1.442695, %v959_v23 }
 0x31c   : > { %v1598_v27 = vpop.f32.mrf.mxu1 }
 0x31d   : > { %1758 = vpow2.f32 %v960_v25 }
 0x32a   : > { %v1759_v28 = vpop.eup %1758 }
 0x32b   : > { %v962_v30 = vadd.f32 1.0, %v1759_v28 }
 0x32d   : > { %v963_v31 = vmul.f32 %v962_v30, %v962_v30 }
 0x32f   : > { %v965_v32 = vadd.f32 1.0, %v963_v31  ;;  %v1488_v33 = vadd.f32 -1.0, %v963_v31 }
 0x331   : > { %1760 = vrcp.f32 %v965_v32 }
 0x33e   : > { %v1761_v34 = vpop.eup %1760 }
 0x33f   : > { %v967_v35 = vmul.f32 %v1761_v34, %v1488_v33 }
 0x341   : > { %v969_v36 = vmul.f32 %v967_v35, %v954_v21 }
 0x343   : > { %v970_v16 = vsel %vm968_vm5, %v954_v21, %v969_v36 }
 0x344   : > { %v971_v37 = vadd.f32 %v970_v16, %v841_v8 }
 0x346   : > { %v972_v38 = vmul.f32 %v2122_v26, %v971_v37  ;;  %v1492_v26 = vld [vmem:[%s1007_s15] ss:$0 sm:$0xff] }
 0x348   : > { %v973_v39 = vadd.f32 %v2124_v29, %v972_v38  ;;  %v986_v29 = vld [vmem:[#allocation2] sm:$0xff] }
 0x34a   : > { %v974_v40 = vmin.f32 %v973_v39, 20.0  ;;  %vm983_vm6 = vcmp.gt.f32.partialorder %v973_v39, 20.0 }
 0x34c   : > { %v975_v41 = vmul.f32 1.442695, %v974_v40 }
 0x34e   : > { %1762 = vpow2.f32 %v975_v41 }
 0x35b   : > { %v1763_v42 = vpop.eup %1762 }
 0x35c   : > { %v977_v43 = vadd.f32 1.0, %v1763_v42 }
 0x35e   : > { %v978_v44 = vmul.f32 %v977_v43, %v977_v43 }
 0x360   : > { %v980_v45 = vadd.f32 1.0, %v978_v44  ;;  %v1489_v46 = vadd.f32 -1.0, %v978_v44 }
 0x362   : > { %1764 = vrcp.f32 %v980_v45 }
 0x36f   : > { %v1765_v47 = vpop.eup %1764 }
 0x370   : > { %v982_v48 = vmul.f32 %v1765_v47, %v1489_v46 }
 0x372   : > { %v984_v49 = vmul.f32 %v982_v48, %v973_v39 }
 0x374   : > { %v985_v50 = vsel %vm983_vm6, %v973_v39, %v984_v49 }
 0x375   : > { %v987_v51 = vpack.c.bf16 %v985_v50, %v985_v50 }
 0x377   : > { %1616 = vmatmul.mubr.bf16.vlgmr.msra.gmra.mxu0 %v987_v51 }
 0x437   : > { %v1097_v52 = vpop.f32.mrf.mxu0 }
 0x438   : > { %v1098_v53 = vadd.f32 %v1492_v26, %v1097_v52 }
 0x439   : > { %v1617_v54 = vpop.f32.mrf.mxu0  ;;  %1109 = sbr.rel (%p1501_p1) target bundleno = 1696 (0x6a0), region = 96 }
 0x43a   : > { %v1103_v55 = vadd.f32 %v1098_v53, %v986_v29 }
 0x43b   : > { %v1100_v56 = vpop.f32.mrf.mxu0 }
 0x43c   : > { %1105 = vst.msk [vmem:[#allocation2] sm:$0xff] %vm1104_vm7, %v1103_v55 }
 0x43d   : > { %v1618_v57 = vpop.f32.mrf.mxu0 }
 0x43e   : > { %v1766_v58 = vld [vmem:[%s2252_s10 + $0x8] sm:$0xff]   ;;  %v1890_v59 = vmov 0.0   ;;  %v1767_v60 = vld [vmem:[%s2252_s10] sm:$0xff]   ;;  %vm1891_vm8 = vmmov 0   ;;  %vm1316_vm9 = vcmask 7168  }
 0x43f   : > { %1619 = vmatprep.subr.bf16.mxu0 %v1890_v59  ;;  %1627 = vmatprep.subr.bf16.mxu1 %v1890_v59  ;;  %v1768_v63 = vld [vmem:[%s2253_s5 + $0x8] sm:$0xff]   ;;  %v1769_v0 = vld [vmem:[%s2253_s5] sm:$0xff]  }
 0x440   : > { %1620 = vmatpush3.bf16.msra.mxu0 %v1766_v58  ;;  %1623 = vmatprep.mubr.msk.bf16.mxu0 %vm1891_vm8, %v1890_v59  ;;  %v1502_v1 = vld [vmem:[%s2254_s19] ss:$0 sm:$0xff]  ;;  %v1770_v10 = vld [vmem:[%s2255_s29 + $0x8] sm:$0xff]  }
 0x441   : > { %1621 = vmatprep.subr.bf16.mxu0 %v1890_v59  ;;  %1631 = vmatprep.mubr.msk.bf16.mxu1 %vm1891_vm8, %v1890_v59  ;;  %v1771_v11 = vld [vmem:[%s2255_s29] sm:$0xff]   ;;  %v1510_v22 = vld [vmem:[#allocation3] ss:$0 sm:$0xff] }
 0x442   : > { %1628 = vmatpush3.bf16.msra.mxu1 %v1768_v63  ;;  %v1506_v12 = vld [vmem:[%s2256_s13] ss:$0 sm:$0xff] }
 0x443   : > { %v1110_v61 = vld [vmem:[#allocation2] sm:$0xff]  ;;  %1629 = vmatprep.subr.bf16.mxu1 %v1890_v59 }
 0x444   : > { %v1111_v62 = vpack.c.bf16 %v1110_v61, %v1110_v61  ;;  %1622 = vmatpush3.bf16.msra.mxu0 %v1767_v60 }
 0x445   : > { %1635 = vmatprep.subr.bf16.mxu0 %v1890_v59 }
 0x446   : > { %1630 = vmatpush3.bf16.msra.mxu1 %v1769_v0 }
 0x447   : > { %1624 = vmatmul.mubr.msk.bf16.vlgmr.msra.gmra.mxu0 %vm1104_vm7, %v1111_v62 }
 0x448   : > { %1639 = vmatprep.mubr.msk.bf16.mxu0 %vm1891_vm8, %v1890_v59  ;;  %1636 = vmatpush3.bf16.msra.mxu0 %v1770_v10 }
 0x449   : > { %1637 = vmatprep.subr.bf16.mxu0 %v1890_v59 }
 0x44c   : > { %1638 = vmatpush3.bf16.msra.mxu0 %v1771_v11 }
 0x507   : > { %v1172_v2 = vpop.f32.mrf.mxu0 }
 0x508   : > { %v1173_v3 = vadd.f32 %v1502_v1, %v1172_v2 }
 0x509   : > { %v1625_v4 = vpop.f32.mrf.mxu0 }
 0x50a   : > { %v1178_v5 = vmax.f32 %v1173_v3, 0.0 }
 0x50b   : > { %v1175_v6 = vpop.f32.mrf.mxu0 }
 0x50c   : > { %v1179_v7 = vmin.f32 %v1178_v5, 1.0 }
 0x50d   : > { %v1626_v8 = vpop.f32.mrf.mxu0 }
 0x50e   : > { %v1180_v9 = vpack.c.bf16 %v1179_v7, %v1179_v7 }
 0x510   : > { %1632 = vmatmul.mubr.msk.bf16.vlgmr.msra.gmra.mxu1 %vm1104_vm7, %v1180_v9 }
 0x5d0   : > { %v1241_v13 = vpop.f32.mrf.mxu1 }
 0x5d1   : > { %v1242_v14 = vadd.f32 %v1506_v12, %v1241_v13 }
 0x5d2   : > { %v1633_v15 = vpop.f32.mrf.mxu1 }
 0x5d3   : > { %v1247_v17 = vmax.f32 %v1242_v14, 0.0 }
 0x5d4   : > { %v1244_v18 = vpop.f32.mrf.mxu1 }
 0x5d5   : > { %v1248_v19 = vmin.f32 %v1247_v17, 1.0 }
 0x5d6   : > { %v1634_v20 = vpop.f32.mrf.mxu1 }
 0x5d7   : > { %v1249_v21 = vpack.c.bf16 %v1248_v19, %v1248_v19 }
 0x5d9   : > { %1640 = vmatmul.mubr.msk.bf16.vlgmr.msra.gmra.mxu0 %vm1104_vm7, %v1249_v21 }
 0x699   : > { %v1310_v23 = vpop.f32.mrf.mxu0 }
 0x69a   : > { %v1311_v24 = vadd.f32 %v1510_v22, %v1310_v23 }
 0x69b   : > { %v1641_v25 = vpop.f32.mrf.mxu0 }
 0x69c   : > { %1317 = vst.msk [vmem:[%s2257_s27] sm:$0xff] %vm1316_vm9, %v1311_v24 }
 0x69d   : > { %v1313_v27 = vpop.f32.mrf.mxu0 }
 0x69f   : > { %v1642_v28 = vpop.f32.mrf.mxu0 }
 0x6a0 PF: > { %s31_s25 = sadd.s32 1, %s1880_s25   ;;  %s2258_s20 = smov %s1864_s21 }
 0x6a1   : > { %p28_p4 = scmp.ge.s32.totalorder %s31_s25, 9   ;;  %s2259_s21 = smov %s1868_s22 }
 0x6a2   : > { %s2260_s22 = smov %s2049_s11  ;;  %s2261_s23 = smov %s1876_s24 }
 0x6a3   : > { %s2262_s24 = smov %s2264_s17  ;;  %30 = sbr.rel (!%p28_p4) target bundleno = 13 (0xd), region = 142 }
 0x6a8   :  { %1337 = vsyncpa [#allocation5], 1 }
 0x6a9   :  { %1339 = vsyncpa [#allocation5 + $0x1], 1 }
 0x6aa   :  { %1340 = vsyncpa [#allocation7], 1 }

</bundles_post_ra>
